<compile_context>
chip_gen: v5e
topology: v5e:2x2
jax: 0.10.0
libtpu: 0.0.40
codegen_flags: <defaults>
</compile_context>

<pallas_src>
import functools

import jax
import jax.numpy as jnp
from jax.experimental import pallas as pl
from jax.experimental.pallas import tpu as pltpu


# --------------------------------------------------------------------------- #
# Kernel
# --------------------------------------------------------------------------- #
def _ts_encoder_kernel(t0_ref, s_ref, wdt_ref, bdt_ref, wtd_ref, btd_ref,
                       t0_out_ref, s_out_ref):
    """One grid step: bn_tile rows of (temp row-0, spat), both packed [r|i]."""
    s = s_ref[...]                                                    # (bn, 2D)

    # ---- D_to_T (ComplexLinear) as a single packed MXU matmul, f32 accumulate ----
    dt = jnp.dot(s, wdt_ref[...], preferred_element_type=jnp.float32)
    dt = dt + bdt_ref[...]                                            # (bn, 2T)

    # temp_emb + pad(D_to_T(spat_emb), (0,0,0,F)) only touches frequency row 0.
    t0 = t0_ref[...].astype(jnp.float32) + dt
    # TODO(synk): TemporalEnc(cfg) internals are not given in the source; identity.
    t0_out_ref[...] = t0.astype(t0_out_ref.dtype)

    # ---- T_to_D applied to temp_emb[:, :, :1, :] ----
    td = jnp.dot(t0.astype(wtd_ref.dtype), wtd_ref[...],
                 preferred_element_type=jnp.float32) + btd_ref[...]   # (bn, 2D)
    # TODO(synk): SpatialEnc(cfg) internals are not given in the source; identity.
    s_out_ref[...] = (s.astype(jnp.float32) + td).astype(s_out_ref.dtype)


# --------------------------------------------------------------------------- #
# Host-side packing (once per model)
# --------------------------------------------------------------------------- #
def pack_params(params, dtype=jnp.float32):
    """Pack each ComplexLinear into one real matmul:
       [xr | xi] @ [[Wr, Wi], [-Wi, Wr]] + [br | bi]  ==  [yr | yi].
    Weights are cast to `dtype` (bf16 on v6e/v7x halves HBM traffic); biases stay f32."""
    def pack(wr, wi, br, bi):
        w = jnp.concatenate(
            [jnp.concatenate([wr, wi], axis=1),
             jnp.concatenate([-wi, wr], axis=1)], axis=0)     # (2*in, 2*out)
        b = jnp.concatenate([br, bi], axis=1)                 # (1, 2*out)
        return w.astype(dtype), b.astype(jnp.float32)

    w_dt, b_dt = pack(*params["D_to_T"])
    w_td, b_td = pack(*params["T_to_D"])
    return {"w_dt": w_dt, "b_dt": b_dt, "w_td": w_td, "b_td": b_td}


def pack_activations(temp_r, temp_i, spat_r, spat_i):
    """Planar [B,N,F+1,T]/[B,N,1,D] real+imag -> contiguous packed kernel slabs.
    In a real model this layout would be carried end-to-end; rows 1..F of temp_emb
    are never touched by the module and stay with the caller."""
    B, N, _, T = temp_r.shape
    D = spat_r.shape[-1]
    temp0 = jnp.concatenate([temp_r[:, :, 0, :], temp_i[:, :, 0, :]], axis=-1)
    spat = jnp.concatenate([spat_r[:, :, 0, :], spat_i[:, :, 0, :]], axis=-1)
    return temp0.reshape(B * N, 2 * T), spat.reshape(B * N, 2 * D)


# --------------------------------------------------------------------------- #
# Tile selection (sublane-legal, minimal grid steps)
# --------------------------------------------------------------------------- #
_MAX_TILE_ROWS = 2048   # ~1.5 KiB/row at D=32,T=16 f32 -> a few MiB double-buffered
_MIN_STEP_ROWS = 512    # never split the grid into steps smaller than this


def _pick_bn_tile(bn):
    """Rows per grid step: a multiple of 8 (f32 sublane) or the full BN.
    grid=(1,) unless a split still leaves >= _MIN_STEP_ROWS rows per step."""
    if bn <= _MAX_TILE_ROWS + _MIN_STEP_ROWS:
        return bn                     # single step; full-dim block is always legal
    return _MAX_TILE_ROWS             # multiple of 8; any ragged tail block is masked


# --------------------------------------------------------------------------- #
# Pallas entry point
# --------------------------------------------------------------------------- #
@functools.partial(jax.jit, donate_argnums=(0, 1))
def ts_encoder_forward(temp0_pk, spat_pk, packed):
    """Fused TS_Encoder forward on packed planar activations.

    temp0_pk: (B*N, 2*T) frequency-row-0 of temp_emb, packed [real | imag].
    spat_pk : (B*N, 2*D) spat_emb, packed [real | imag].
    Returns (temp0_out_pk, spat_out_pk), same shapes/dtypes (aliased in place).
    """
    BN, twoT = temp0_pk.shape
    _, twoD = spat_pk.shape
    w_dt, b_dt = packed["w_dt"], packed["b_dt"]
    w_td, b_td = packed["w_td"], packed["b_td"]

    bn_tile = _pick_bn_tile(BN)
    grid = (pl.cdiv(BN, bn_tile),)

    temp_spec = pl.BlockSpec((bn_tile, twoT), lambda i: (i, 0))
    spat_spec = pl.BlockSpec((bn_tile, twoD), lambda i: (i, 0))

    def resident(shape):   # weights/biases: same block every step -> stay in VMEM
        return pl.BlockSpec(shape, lambda i: (0,) * len(shape))

    # Explicit VMEM budget: double-buffered in+out activation blocks + resident
    # weights + headroom. Clamped to stay inside v7x's 64 MiB (and above v5e's
    # 16 MiB scoped default so larger tiles don't fail compile there).
    act_bytes = bn_tile * (twoT * temp0_pk.dtype.itemsize
                           + twoD * spat_pk.dtype.itemsize)
    w_bytes = (w_dt.size * w_dt.dtype.itemsize + w_td.size * w_td.dtype.itemsize
               + (b_dt.size + b_td.size) * 4)
    vmem_limit = int(min(max(4 * act_bytes + w_bytes + (8 << 20), 32 << 20), 48 << 20))

    return pl.pallas_call(
        _ts_encoder_kernel,
        grid=grid,
        in_specs=[temp_spec, spat_spec,
                  resident(w_dt.shape), resident(b_dt.shape),
                  resident(w_td.shape), resident(b_td.shape)],
        out_specs=[temp_spec, spat_spec],
        out_shape=[jax.ShapeDtypeStruct(temp0_pk.shape, temp0_pk.dtype),
                   jax.ShapeDtypeStruct(spat_pk.shape, spat_pk.dtype)],
        # In-place update: both activation slabs alias their outputs.
        input_output_aliases={0: 0, 1: 1},
        compiler_params=pltpu.CompilerParams(
            dimension_semantics=("parallel",),
            vmem_limit_bytes=vmem_limit),
    )(temp0_pk, spat_pk, w_dt, b_dt, w_td, b_td)


# --------------------------------------------------------------------------- #
# Reference + demo
# --------------------------------------------------------------------------- #
def _init_complex_linear(key, d_in, d_out):
    """Deterministic ComplexLinear params (two real nn.Linear-style layers),
    pre-transposed to [in_features, out_features]."""
    k1, k2, k3, k4 = jax.random.split(key, 4)
    bound = 1.0 / float(d_in) ** 0.5
    wr = jax.random.uniform(k1, (d_in, d_out), jnp.float32, -bound, bound)
    wi = jax.random.uniform(k2, (d_in, d_out), jnp.float32, -bound, bound)
    br = jax.random.uniform(k3, (1, d_out), jnp.float32, -bound, bound)
    bi = jax.random.uniform(k4, (1, d_out), jnp.float32, -bound, bound)
    return wr, wi, br, bi


def _reference_planar(temp_r, temp_i, spat_r, spat_i, params, F):
    """Pure-JAX reference of the TS_Encoder forward on real/imag planes."""
    wdt_r, wdt_i, bdt_r, bdt_i = params["D_to_T"]
    wtd_r, wtd_i, btd_r, btd_i = params["T_to_D"]
    dt_r = spat_r @ wdt_r - spat_i @ wdt_i + bdt_r              # [B,N,1,T]
    dt_i = spat_r @ wdt_i + spat_i @ wdt_r + bdt_i
    pad = ((0, 0), (0, 0), (0, F), (0, 0))
    temp_out_r = temp_r + jnp.pad(dt_r, pad)
    temp_out_i = temp_i + jnp.pad(dt_i, pad)
    x_r = temp_out_r[:, :, :1, :]
    x_i = temp_out_i[:, :, :1, :]
    sd_r = x_r @ wtd_r - x_i @ wtd_i + btd_r                    # [B,N,1,D]
    sd_i = x_r @ wtd_i + x_i @ wtd_r + btd_i
    return temp_out_r, temp_out_i, spat_r + sd_r, spat_i + sd_i


if __name__ == "__main__":
    # Small config: embed_dim D=32, n_frequencies F=7, n_channels=3 -> N=4, n_times T=16.
    B, D, F, T = 2, 32, 7, 16
    N = 3 + 1
    F1 = F + 1

    key = jax.random.PRNGKey(0)
    ks = jax.random.split(key, 6)
    temp_r = jax.random.normal(ks[0], (B, N, F1, T), jnp.float32)
    temp_i = jax.random.normal(ks[1], (B, N, F1, T), jnp.float32)
    spat_r = jax.random.normal(ks[2], (B, N, 1, D), jnp.float32)
    spat_i = jax.random.normal(ks[3], (B, N, 1, D), jnp.float32)

    params = {
        "D_to_T": _init_complex_linear(ks[4], D, T),
        "T_to_D": _init_complex_linear(ks[5], T, D),
    }

    ref = jax.block_until_ready(
        _reference_planar(temp_r, temp_i, spat_r, spat_i, params, F))
    ref_t_r, ref_t_i, ref_s_r, ref_s_i = ref

    def run_and_check(dtype, atol, rtol):
        packed = pack_params(params, dtype=dtype)
        t0_pk, s_pk = pack_activations(temp_r, temp_i, spat_r, spat_i)
        t0_pk = t0_pk.astype(dtype)
        s_pk = s_pk.astype(dtype)
        t0_out, s_out = jax.block_until_ready(
            ts_encoder_forward(t0_pk, s_pk, packed))
        t0_out = t0_out.astype(jnp.float32)
        s_out = s_out.astype(jnp.float32)
        # Reassemble full module outputs; rows 1..F of temp_emb are untouched.
        temp_out_r = temp_r.at[:, :, 0, :].set(t0_out[:, :T].reshape(B, N, T))
        temp_out_i = temp_i.at[:, :, 0, :].set(t0_out[:, T:].reshape(B, N, T))
        spat_out_r = s_out[:, :D].reshape(B, N, 1, D)
        spat_out_i = s_out[:, D:].reshape(B, N, 1, D)
        for got, want in [(temp_out_r, ref_t_r), (temp_out_i, ref_t_i),
                          (spat_out_r, ref_s_r), (spat_out_i, ref_s_i)]:
            assert got.shape == want.shape
            assert jnp.allclose(got, want, atol=atol, rtol=rtol), str(dtype)

    run_and_check(jnp.float32, atol=1e-4, rtol=1e-4)    # exact-path check
    run_and_check(jnp.bfloat16, atol=1e-1, rtol=5e-2)   # halved-HBM path (v6e/v7x)

    print("KERNEL_OK")
</pallas_src>

<mosaic_0001>
module attributes {stable_mosaic.version = 11 : i64} {
  func.func @_ts_encoder_kernel(%arg0: i32, %arg1: memref<8x32xf32, #tpu.memory_space<vmem>>, %arg2: memref<8x64xf32, #tpu.memory_space<vmem>>, %arg3: memref<64x32xf32, #tpu.memory_space<vmem>>, %arg4: memref<1x32xf32, #tpu.memory_space<vmem>>, %arg5: memref<32x64xf32, #tpu.memory_space<vmem>>, %arg6: memref<1x64xf32, #tpu.memory_space<vmem>>, %arg7: memref<8x32xf32, #tpu.memory_space<vmem>>, %arg8: memref<8x64xf32, #tpu.memory_space<vmem>>) attributes {dimension_semantics = [#tpu.dimension_semantics<parallel>], iteration_bounds = array<i64: 1>, scalar_prefetch = 0 : i64, scratch_operands = 0 : i64, tpu.core_type = #tpu.core_type<tc>, window_params = [{transform_indices = @transform_0, window_bounds = array<i64: 8, 32>}, {transform_indices = @transform_1, window_bounds = array<i64: 8, 64>}, {pipeline_mode = #tpu.pipeline_mode<synchronous>, transform_indices = @transform_2, window_bounds = array<i64: 64, 32>}, {pipeline_mode = #tpu.pipeline_mode<synchronous>, transform_indices = @transform_3, window_bounds = array<i64: 1, 32>}, {pipeline_mode = #tpu.pipeline_mode<synchronous>, transform_indices = @transform_4, window_bounds = array<i64: 32, 64>}, {pipeline_mode = #tpu.pipeline_mode<synchronous>, transform_indices = @transform_5, window_bounds = array<i64: 1, 64>}, {transform_indices = @transform_6, window_bounds = array<i64: 8, 32>}, {transform_indices = @transform_7, window_bounds = array<i64: 8, 64>}]} {
    %c0 = arith.constant 0 : index
    %c0_0 = arith.constant 0 : index
    %0 = vector.load %arg2[%c0, %c0_0] : memref<8x64xf32, #tpu.memory_space<vmem>>, vector<8x64xf32>
    %c0_1 = arith.constant 0 : index
    %c0_2 = arith.constant 0 : index
    %1 = vector.load %arg3[%c0_1, %c0_2] : memref<64x32xf32, #tpu.memory_space<vmem>>, vector<64x32xf32>
    %cst = arith.constant dense<0.000000e+00> : vector<8x32xf32>
    %2 = tpu.matmul %0, %1, %cst {dimension_numbers = #tpu.dot_dimension_numbers<[1], [0], [0], [1], [0, 0, 1, 1], [], []>} : vector<8x64xf32>, vector<64x32xf32>, vector<8x32xf32> -> vector<8x32xf32>
    %c0_3 = arith.constant 0 : index
    %c0_4 = arith.constant 0 : index
    %3 = vector.load %arg4[%c0_3, %c0_4] : memref<1x32xf32, #tpu.memory_space<vmem>>, vector<1x32xf32>
    %4 = vector.broadcast %3 : vector<1x32xf32> to vector<8x32xf32>
    %5 = arith.addf %2, %4 : vector<8x32xf32>
    %c0_5 = arith.constant 0 : index
    %c0_6 = arith.constant 0 : index
    %6 = vector.load %arg1[%c0_5, %c0_6] : memref<8x32xf32, #tpu.memory_space<vmem>>, vector<8x32xf32>
    %7 = arith.addf %6, %5 : vector<8x32xf32>
    %c0_7 = arith.constant 0 : index
    %c0_8 = arith.constant 0 : index
    %8 = vector.load %arg7[%c0_7, %c0_8] : memref<8x32xf32, #tpu.memory_space<vmem>>, vector<8x32xf32>
    tpu.vector_store %arg7[%c0_7, %c0_8], %7 {strides = array<i32>} : memref<8x32xf32, #tpu.memory_space<vmem>>, vector<8x32xf32>,
    %c0_9 = arith.constant 0 : index
    %c0_10 = arith.constant 0 : index
    %9 = vector.load %arg5[%c0_9, %c0_10] : memref<32x64xf32, #tpu.memory_space<vmem>>, vector<32x64xf32>
    %cst_11 = arith.constant dense<0.000000e+00> : vector<8x64xf32>
    %10 = tpu.matmul %7, %9, %cst_11 {dimension_numbers = #tpu.dot_dimension_numbers<[1], [0], [0], [1], [0, 0, 1, 1], [], []>} : vector<8x32xf32>, vector<32x64xf32>, vector<8x64xf32> -> vector<8x64xf32>
    %c0_12 = arith.constant 0 : index
    %c0_13 = arith.constant 0 : index
    %11 = vector.load %arg6[%c0_12, %c0_13] : memref<1x64xf32, #tpu.memory_space<vmem>>, vector<1x64xf32>
    %12 = vector.broadcast %11 : vector<1x64xf32> to vector<8x64xf32>
    %13 = arith.addf %10, %12 : vector<8x64xf32>
    %14 = arith.addf %0, %13 : vector<8x64xf32>
    %c0_14 = arith.constant 0 : index
    %c0_15 = arith.constant 0 : index
    %15 = vector.load %arg8[%c0_14, %c0_15] : memref<8x64xf32, #tpu.memory_space<vmem>>, vector<8x64xf32>
    tpu.vector_store %arg8[%c0_14, %c0_15], %14 {strides = array<i32>} : memref<8x64xf32, #tpu.memory_space<vmem>>, vector<8x64xf32>,
    return
  }
  func.func @transform_0(%arg0: i32) -> (i32, i32) {
    %c0_i32 = arith.constant 0 : i32
    %c0_i32_0 = arith.constant 0 : i32
    return %arg0, %c0_i32 : i32, i32
  }
  func.func @transform_1(%arg0: i32) -> (i32, i32) {
    %c0_i32 = arith.constant 0 : i32
    %c0_i32_0 = arith.constant 0 : i32
    return %arg0, %c0_i32 : i32, i32
  }
  func.func @transform_2(%arg0: i32) -> (i32, i32) {
    %c0_i32 = arith.constant 0 : i32
    %c0_i32_0 = arith.constant 0 : i32
    %c0_i32_1 = arith.constant 0 : i32
    return %c0_i32, %c0_i32_0 : i32, i32
  }
  func.func @transform_3(%arg0: i32) -> (i32, i32) {
    %c0_i32 = arith.constant 0 : i32
    %c0_i32_0 = arith.constant 0 : i32
    %c0_i32_1 = arith.constant 0 : i32
    return %c0_i32, %c0_i32_0 : i32, i32
  }
  func.func @transform_4(%arg0: i32) -> (i32, i32) {
    %c0_i32 = arith.constant 0 : i32
    %c0_i32_0 = arith.constant 0 : i32
    %c0_i32_1 = arith.constant 0 : i32
    return %c0_i32, %c0_i32_0 : i32, i32
  }
  func.func @transform_5(%arg0: i32) -> (i32, i32) {
    %c0_i32 = arith.constant 0 : i32
    %c0_i32_0 = arith.constant 0 : i32
    %c0_i32_1 = arith.constant 0 : i32
    return %c0_i32, %c0_i32_0 : i32, i32
  }
  func.func @transform_6(%arg0: i32) -> (i32, i32) {
    %c0_i32 = arith.constant 0 : i32
    %c0_i32_0 = arith.constant 0 : i32
    return %arg0, %c0_i32 : i32, i32
  }
  func.func @transform_7(%arg0: i32) -> (i32, i32) {
    %c0_i32 = arith.constant 0 : i32
    %c0_i32_0 = arith.constant 0 : i32
    return %arg0, %c0_i32 : i32, i32
  }
}

</mosaic_0001>

<bundles_post_ra>
// kernel: ts_encoder_forward.1
= control target key start
LH: loop header
LB: loop body
LE: loop exit
PB: predicated region body
PF: predicated region fallthrough
CT: control target
= control target key end

     0   :  { %13 = vsyncpa [#allocation3], 0  ;;  %s375_s0 = inlined_call_operand.hbm [shape: f32[8,32], index: 0, kind: input, shape index: {}, may-alias: {0,6}]   ;;  %s376_s1 = inlined_call_operand.hbm [shape: f32[8,64], index: 1, kind: input, shape index: {}, may-alias: {1,7}]   ;;  %s377_s2 = inlined_call_operand.vmem [shape: f32[64,32], index: 2, kind: input, shape index: {}]   ;;  %s378_s3 = inlined_call_operand.vmem [shape: f32[1,32], index: 3, kind: input, shape index: {}]   ;;  %s379_s4 = inlined_call_operand.vmem [shape: f32[32,64], index: 4, kind: input, shape index: {}]   ;;  %s380_s5 = inlined_call_operand.vmem [shape: f32[1,64], index: 5, kind: input, shape index: {}]   ;;  %s381_s6 = inlined_call_operand.hbm [shape: f32[8,32], index: 6, kind: output, shape index: {0}, may-alias: {0,6}]   ;;  %s382_s7 = inlined_call_operand.hbm [shape: f32[8,64], index: 7, kind: output, shape index: {1}, may-alias: {1,7}]  }
   0x1   :  { %14 = vsyncpa [#allocation6], 0 }
   0x2   :  { %15 = vsyncpa [#allocation4], 0 }
   0x3   :  { %16 = vsyncpa [#allocation9], 0  ;;  %s22_s26 = sshll.u32 %s375_s0, 4  ;;  %s275_s27 = smov [#allocation2]   ;;  %s23_s26 = int_to_ptr.hbm [resolvable:$true] %s22_s26 }
   0x4   :  { %s24_s28 = sshll.u32 %s275_s27, 4  ;;  %s33_s8 = sshll.u32 %s376_s1, 4  ;;  %s25_s28 = int_to_ptr.vmem [resolvable:$true] %s24_s28  ;;  %s34_s8 = int_to_ptr.hbm [resolvable:$true] %s33_s8 }
   0x5   :  { %27 = dma.hbm_to_vmem [thread:$0]  %s23_s26, 128, %s25_s28, [#allocation3]  }
   0x6   :  { %s276_s9 = smov [#allocation5]  }
   0x7   :  { %s35_s10 = sshll.u32 %s276_s9, 4  ;;  %s36_s10 = int_to_ptr.vmem [resolvable:$true] %s35_s10 }
   0x8   :  { %38 = dma.hbm_to_vmem [thread:$0]  %s34_s8, 128, %s36_s10, [#allocation6]  }
   0x9   :  { %267 = dma.done.wait [#allocation3], 128  }
   0xa   :  { %268 = vsyncadd [#allocation3], 4294967168 }
   0xb   :  { %269 = dma.done.wait [#allocation6], 128  }
   0xc   :  { %270 = vsyncadd [#allocation6], 4294967168  ;;  %v63_v0 = vld [vmem:[%s377_s2 + $0x38] sm:$0xff]  ;;  %v62_v1 = vld [vmem:[%s377_s2 + $0x30] sm:$0xff]  ;;  %vm68_vm0 = vcmask 523264   ;;  %vm94_vm1 = vcmask 261120  }
   0xd   :  { %80 = vmatpush.msra.mxu0 %v63_v0  ;;  %v61_v2 = vld [vmem:[%s377_s2 + $0x28] sm:$0xff]  ;;  %v99_v3 = vld [vmem:[%s379_s4 + $0x18] sm:$0xff]  ;;  %v60_v4 = vld [vmem:[%s377_s2 + $0x20] sm:$0xff]  ;;  %s277_s11 = smov [#allocation7]   ;;  %s136_s1 = sshll.u32 %s381_s6, 4  ;;  %s137_s1 = int_to_ptr.hbm [resolvable:$true] %s136_s1 }
   0xe   :  { %119 = vmatpush.msra.mxu1 %v99_v3  ;;  %v59_v5 = vld [vmem:[%s377_s2 + $0x18] sm:$0xff]  ;;  %v58_v6 = vld [vmem:[%s377_s2 + $0x10] sm:$0xff]  ;;  %v57_v7 = vld [vmem:[%s377_s2 + $0x8] sm:$0xff]  ;;  %s134_s0 = sshll.u32 %s277_s11, 4  ;;  %s147_s18 = sshll.u32 %s382_s7, 4  ;;  %s135_s0 = int_to_ptr.vmem [resolvable:$true] %s134_s0  ;;  %s148_s18 = int_to_ptr.hbm [resolvable:$true] %s147_s18 }
   0xf   :  { %81 = vmatpush.msra.mxu0 %v62_v1  ;;  %v56_v8 = vld [vmem:[%s377_s2] sm:$0xff]  ;;  %v55_v9 = vld [vmem:[#allocation5] sm:$0xff]  ;;  %v98_v10 = vld [vmem:[%s379_s4 + $0x10] sm:$0xff] }
  0x10   :  { %120 = vmatpush.msra.mxu1 %v98_v10  ;;  %v97_v11 = vld [vmem:[%s379_s4 + $0x8] sm:$0xff]  ;;  %v96_v12 = vld [vmem:[%s379_s4] sm:$0xff] }
  0x11   :  { %82 = vmatpush.msra.mxu0 %v61_v2  ;;  %v169_v13 = vld [vmem:[%s378_s3] ss:$0 sm:$0xff]  ;;  %s278_s3 = smov [#allocation8]  }
  0x12   :  { %121 = vmatpush.msra.mxu1 %v97_v11  ;;  %v92_v15 = vld [vmem:[#allocation2] sm:$0xff]  ;;  %s145_s15 = sshll.u32 %s278_s3, 4  ;;  %s146_s15 = int_to_ptr.vmem [resolvable:$true] %s145_s15 }
  0x13   :  { %83 = vmatpush.msra.mxu0 %v60_v4  ;;  %v170_v18 = vld [vmem:[%s380_s5] ss:$0 sm:$0xff] }
  0x14   :  { %122 = vmatpush.msra.mxu1 %v96_v12 }
  0x15   :  { %84 = vmatpush.msra.mxu0 %v59_v5 }
  0x17   :  { %85 = vmatpush.msra.mxu0 %v58_v6 }
  0x19   :  { %86 = vmatpush.msra.mxu0 %v57_v7 }
  0x1b   :  { %87 = vmatpush.msra.mxu0 %v56_v8 }
  0x1c   :  { %163 = vmatmul.msk.f32.vlgmr.msra.gmra.mxu0 %vm68_vm0, %v55_v9 }
  0x99   :  { %v89_v14 = vpop.f32.mrf.mxu0 }
  0x9a   :  { %v90_v16 = vadd.f32 %v169_v13, %v89_v14 }
  0x9c   :  { %v93_v17 = vadd.f32 %v92_v15, %v90_v16 }
  0x9e   :  { %164 = vmatmul.msk.f32.vlgmr.msra.gmra.mxu1 %vm94_vm1, %v93_v17  ;;  %95 = vst.msk [vmem:[#allocation7] sm:$0xff] %vm94_vm1, %v93_v17 }
  0x9f   :  { %139 = dma.vmem_to_hbm [thread:$0]  %s135_s0, 128, %s137_s1, [#allocation4]  }
 0x11b   :  { %v124_v19 = vpop.f32.mrf.mxu1 }
 0x11c   :  { %v125_v20 = vadd.f32 %v170_v18, %v124_v19 }
 0x11e   :  { %v127_v21 = vadd.f32 %v125_v20, %v55_v9 }
 0x120   :  { %128 = vst.msk [vmem:[#allocation8] sm:$0xff] %vm68_vm0, %v127_v21 }
 0x121   :  { %150 = dma.vmem_to_hbm [thread:$0]  %s146_s15, 128, %s148_s18, [#allocation9]  }
 0x122   :  { %271 = dma.done.wait [#allocation4], 128  }
 0x123   :  { %272 = vsyncadd [#allocation4], 4294967168 }
 0x124   :  { %273 = dma.done.wait [#allocation9], 128  }
 0x125   :  { %274 = vsyncadd [#allocation9], 4294967168 }
 0x126   :  { %159 = vsyncpa [#allocation3], 1 }
 0x127   :  { %160 = vsyncpa [#allocation6], 1 }
 0x128   :  { %161 = vsyncpa [#allocation4], 1 }
 0x129   :  { %162 = vsyncpa [#allocation9], 1 }

</bundles_post_ra>
